<compile_context>
chip_gen: v7x
topology: tpu7x:2x2x1
jax: 0.10.0
libtpu: 0.0.40
codegen_flags: <defaults>
</compile_context>

<pallas_src>
import functools

import jax
import jax.numpy as jnp
from jax.experimental import pallas as pl
from jax.experimental.pallas import tpu as pltpu


def _round_up(x, m):
    return (x + m - 1) // m * m


def _lora_body(x_ref, wt_ref, wdt_ref, wut_ref, b_ref, o_ref, acc_ref, down_ref):
    # x_ref:    (tm, tk)   input row/K tile
    # wt_ref:   (tk, tn)   base weight, pre-transposed (K, N) tile
    # wdt_ref:  (tk, r)    lora_down, pre-transposed (K, r) tile
    # wut_ref:  (r, tn)    lora_up * scale, pre-transposed (r, N) tile
    # b_ref:    (1, tn)    bias tile (or None)
    # o_ref:    (tm, tn)   output tile
    # acc_ref:  (tm, tn)   f32 accumulator scratch (persists over K)
    # down_ref: (tm, r)    f32 LoRA-down accumulator scratch (persists over N, K)
    j = pl.program_id(1)
    k = pl.program_id(2)
    nk = pl.num_programs(2)

    @pl.when(k == 0)
    def _init_acc():
        acc_ref[...] = jnp.zeros_like(acc_ref)

    @pl.when(jnp.logical_and(j == 0, k == 0))
    def _init_down():
        down_ref[...] = jnp.zeros_like(down_ref)

    x = x_ref[...]

    # Base GEMM partial: x_tile @ W.T_tile  (MXU, f32 accumulate).
    acc_ref[...] += jnp.dot(x, wt_ref[...], preferred_element_type=jnp.float32)

    # Rank-r down projection: computed only for the first N-tile of this row
    # block, then reused for all subsequent N-tiles (scratch persists).
    @pl.when(j == 0)
    def _down():
        down_ref[...] += jnp.dot(x, wdt_ref[...],
                                 preferred_element_type=jnp.float32)

    @pl.when(k == nk - 1)
    def _finalize():
        up = jnp.dot(down_ref[...], wut_ref[...].astype(jnp.float32),
                     preferred_element_type=jnp.float32)
        out = acc_ref[...] + up
        if b_ref is not None:
            out = out + b_ref[...].astype(jnp.float32)
        o_ref[...] = out.astype(o_ref.dtype)


def _lora_kernel(x_ref, wt_ref, wdt_ref, wut_ref, o_ref, acc_ref, down_ref):
    _lora_body(x_ref, wt_ref, wdt_ref, wut_ref, None, o_ref, acc_ref, down_ref)


def _lora_kernel_bias(x_ref, wt_ref, wdt_ref, wut_ref, b_ref, o_ref, acc_ref,
                      down_ref):
    _lora_body(x_ref, wt_ref, wdt_ref, wut_ref, b_ref, o_ref, acc_ref, down_ref)


def lora_injected_linear(x, w, b, w_down, w_up, *, scale=1.0,
                         tm=256, tn=256, tk=512):
    """Pallas forward for LoraInjectedLinear.

    x: (..., in_features); w: (out, in); b: (out,) or None;
    w_down: (r, in); w_up: (out, r).
    """
    in_features = x.shape[-1]
    out_features = w.shape[0]
    r = w_down.shape[0]
    lead = x.shape[:-1]
    x2d = x.reshape(-1, in_features)
    M, K, N = x2d.shape[0], in_features, out_features
    dtype = x2d.dtype

    # Tile alignment: sublanes in multiples of 8 (16 for packed bf16), lanes 128.
    row_align = 16 if dtype == jnp.bfloat16 else 8
    tm = _round_up(min(tm, _round_up(M, row_align)), row_align)
    tn = _round_up(min(tn, _round_up(N, 128)), 128)
    tk = _round_up(min(tk, _round_up(K, 128)), 128)

    Mp = _round_up(M, tm)
    Np = _round_up(N, tn)
    Kp = _round_up(K, tk)

    # Zero-pad operands; pre-transpose weights so every in-kernel dot contracts
    # directly (no XLU relayouts); fold `scale` into the up-projection weight.
    xp = jnp.zeros((Mp, Kp), dtype).at[:M, :K].set(x2d)
    wt = jnp.zeros((Kp, Np), w.dtype).at[:K, :N].set(w.T)
    wdt = jnp.zeros((Kp, r), w_down.dtype).at[:K, :].set(w_down.T)
    wut = jnp.zeros((r, Np), w_up.dtype).at[:, :N].set(w_up.T * scale)

    grid = (Mp // tm, Np // tn, Kp // tk)

    in_specs = [
        pl.BlockSpec((tm, tk), lambda i, j, k: (i, k)),   # x row/K tile
        pl.BlockSpec((tk, tn), lambda i, j, k: (k, j)),   # W.T tile
        pl.BlockSpec((tk, r), lambda i, j, k: (k, 0)),    # W_down.T tile
        pl.BlockSpec((r, tn), lambda i, j, k: (0, j)),    # W_up.T * scale tile
    ]
    operands = [xp, wt, wdt, wut]
    if b is not None:
        bp = jnp.zeros((1, Np), b.dtype).at[0, :N].set(b)
        in_specs.append(pl.BlockSpec((1, tn), lambda i, j, k: (0, j)))
        operands.append(bp)
        kernel = _lora_kernel_bias
    else:
        kernel = _lora_kernel

    # Explicit VMEM budget: double-buffered inputs/outputs + f32 scratch,
    # with headroom (floor at the default scoped limit, cap below physical).
    x_isz = jnp.dtype(dtype).itemsize
    w_isz = jnp.dtype(w.dtype).itemsize
    vmem_bytes = (
        2 * (tm * tk * x_isz + tk * tn * w_isz + tk * r * w_isz
             + r * tn * w_isz + tn * w_isz)
        + 2 * tm * tn * x_isz
        + tm * tn * 4 + tm * r * 4
    )
    vmem_limit = int(min(max(4 * vmem_bytes, 32 << 20), 96 << 20))

    out = pl.pallas_call(
        kernel,
        out_shape=jax.ShapeDtypeStruct((Mp, Np), dtype),
        grid_spec=pltpu.PrefetchScalarGridSpec(
            num_scalar_prefetch=0,
            grid=grid,
            in_specs=in_specs,
            out_specs=pl.BlockSpec((tm, tn), lambda i, j, k: (i, j)),
            scratch_shapes=[
                pltpu.VMEM((tm, tn), jnp.float32),   # base accumulator
                pltpu.VMEM((tm, r), jnp.float32),    # LoRA down accumulator
            ],
        ),
        compiler_params=pltpu.CompilerParams(
            # j must stay sequential per core: the (tm, r) down-scratch computed
            # at j==0 is reused by later N-tiles of the same row block.
            dimension_semantics=("parallel", "arbitrary", "arbitrary"),
            vmem_limit_bytes=vmem_limit,
        ),
    )(*operands)

    return out[:M, :N].reshape(*lead, out_features)


def _reference_forward(x, w, b, w_down, w_up, scale):
    x2d = x.reshape(-1, x.shape[-1])
    out = x2d @ w.T + ((x2d @ w_down.T) @ w_up.T) * scale
    if b is not None:
        out = out + b[None, :]
    return out.reshape(*x.shape[:-1], w.shape[0])


if __name__ == "__main__":
    # Module config (LoraInjectedLinear: bias=False default, r=4).
    in_features, out_features, r = 32, 64, 4
    batch, seq = 2, 8
    scale = 1.0

    key = jax.random.PRNGKey(0)
    k_x, k_w, k_down, k_up, k_b, k_x2 = jax.random.split(key, 6)

    # Synthetic parameters mirroring __init__ (no checkpoint):
    #   nn.Linear weight ~ U(-1/sqrt(in), 1/sqrt(in)); lora_down ~ N(0, 1/r).
    # lora_up is zero-initialized in the module; use small random values here
    # so the LoRA path is actually exercised numerically (same forward math).
    bound = 1.0 / (in_features ** 0.5)
    w = jax.random.uniform(k_w, (out_features, in_features),
                           minval=-bound, maxval=bound, dtype=jnp.float32)
    w_down = (1.0 / r) * jax.random.normal(
        k_down, (r, in_features), dtype=jnp.float32)
    w_up = 0.01 * jax.random.normal(k_up, (out_features, r), dtype=jnp.float32)

    x = jax.random.normal(k_x, (batch, seq, in_features), dtype=jnp.float32)

    # 1) bias=False (module default).
    out = jax.block_until_ready(
        lora_injected_linear(x, w, None, w_down, w_up, scale=scale))
    ref = _reference_forward(x, w, None, w_down, w_up, scale)
    assert out.shape == (batch, seq, out_features)
    assert jnp.allclose(out, ref, atol=1e-5, rtol=1e-5)

    # 2) bias=True path.
    b = 0.1 * jax.random.normal(k_b, (out_features,), dtype=jnp.float32)
    out_b = jax.block_until_ready(
        lora_injected_linear(x, w, b, w_down, w_up, scale=scale))
    ref_b = _reference_forward(x, w, b, w_down, w_up, scale)
    assert jnp.allclose(out_b, ref_b, atol=1e-5, rtol=1e-5)

    # 3) Row count not a multiple of 8 (exercises M padding path).
    x_odd = jax.random.normal(k_x2, (batch, 7, in_features), dtype=jnp.float32)
    out_odd = jax.block_until_ready(
        lora_injected_linear(x_odd, w, None, w_down, w_up, scale=scale))
    ref_odd = _reference_forward(x_odd, w, None, w_down, w_up, scale)
    assert out_odd.shape == (batch, 7, out_features)
    assert jnp.allclose(out_odd, ref_odd, atol=1e-5, rtol=1e-5)

    print("KERNEL_OK")
</pallas_src>

<mosaic_0001>
module attributes {stable_mosaic.version = 11 : i64} {
  func.func @_lora_kernel(%arg0: i32, %arg1: i32, %arg2: i32, %arg3: memref<16x128xf32, #tpu.memory_space<vmem>>, %arg4: memref<128x128xf32, #tpu.memory_space<vmem>>, %arg5: memref<128x4xf32, #tpu.memory_space<vmem>>, %arg6: memref<4x128xf32, #tpu.memory_space<vmem>>, %arg7: memref<16x128xf32, #tpu.memory_space<vmem>>, %arg8: memref<16x128xf32, #tpu.memory_space<vmem>>, %arg9: memref<16x4xf32, #tpu.memory_space<vmem>>) attributes {dimension_semantics = [#tpu.dimension_semantics<parallel>, #tpu.dimension_semantics<arbitrary>, #tpu.dimension_semantics<arbitrary>], iteration_bounds = array<i64: 1, 1, 1>, scalar_prefetch = 0 : i64, scratch_operands = 2 : i64, tpu.core_type = #tpu.core_type<tc>, window_params = [{transform_indices = @transform_0, window_bounds = array<i64: 16, 128>}, {transform_indices = @transform_1, window_bounds = array<i64: 128, 128>}, {transform_indices = @transform_2, window_bounds = array<i64: 128, 4>}, {transform_indices = @transform_3, window_bounds = array<i64: 4, 128>}, {transform_indices = @transform_4, window_bounds = array<i64: 16, 128>}]} {
    %c0_i32 = arith.constant 0 : i32
    %0 = arith.cmpi eq, %arg2, %c0_i32 : i32
    %1 = arith.extui %0 : i1 to i32
    %c0_i32_0 = arith.constant 0 : i32
    %2 = arith.cmpi ne, %1, %c0_i32_0 : i32
    scf.if %2 {
      %cst_15 = arith.constant 0.000000e+00 : f32
      %20 = vector.broadcast %cst_15 : f32 to vector<16x128xf32>
      %c0_16 = arith.constant 0 : index
      %c0_17 = arith.constant 0 : index
      %21 = vector.load %arg8[%c0_16, %c0_17] : memref<16x128xf32, #tpu.memory_space<vmem>>, vector<16x128xf32>
      tpu.vector_store %arg8[%c0_16, %c0_17], %20 {strides = array<i32>} : memref<16x128xf32, #tpu.memory_space<vmem>>, vector<16x128xf32>,
    } else {
    }
    %c0_i32_1 = arith.constant 0 : i32
    %3 = arith.cmpi eq, %arg1, %c0_i32_1 : i32
    %c0_i32_2 = arith.constant 0 : i32
    %4 = arith.cmpi eq, %arg2, %c0_i32_2 : i32
    %5 = arith.andi %3, %4 : i1
    %6 = arith.extui %5 : i1 to i32
    %c0_i32_3 = arith.constant 0 : i32
    %7 = arith.cmpi ne, %6, %c0_i32_3 : i32
    scf.if %7 {
      %cst_15 = arith.constant 0.000000e+00 : f32
      %20 = vector.broadcast %cst_15 : f32 to vector<16x4xf32>
      %c0_16 = arith.constant 0 : index
      %c0_17 = arith.constant 0 : index
      %21 = vector.load %arg9[%c0_16, %c0_17] : memref<16x4xf32, #tpu.memory_space<vmem>>, vector<16x4xf32>
      tpu.vector_store %arg9[%c0_16, %c0_17], %20 {strides = array<i32>} : memref<16x4xf32, #tpu.memory_space<vmem>>, vector<16x4xf32>,
    } else {
    }
    %c0 = arith.constant 0 : index
    %c0_4 = arith.constant 0 : index
    %8 = vector.load %arg3[%c0, %c0_4] : memref<16x128xf32, #tpu.memory_space<vmem>>, vector<16x128xf32>
    %c0_5 = arith.constant 0 : index
    %c0_6 = arith.constant 0 : index
    %9 = vector.load %arg8[%c0_5, %c0_6] : memref<16x128xf32, #tpu.memory_space<vmem>>, vector<16x128xf32>
    %c0_7 = arith.constant 0 : index
    %c0_8 = arith.constant 0 : index
    %10 = vector.load %arg4[%c0_7, %c0_8] : memref<128x128xf32, #tpu.memory_space<vmem>>, vector<128x128xf32>
    %cst = arith.constant dense<0.000000e+00> : vector<16x128xf32>
    %11 = tpu.matmul %8, %10, %cst {dimension_numbers = #tpu.dot_dimension_numbers<[1], [0], [0], [1], [0, 0, 1, 1], [], []>} : vector<16x128xf32>, vector<128x128xf32>, vector<16x128xf32> -> vector<16x128xf32>
    %12 = arith.addf %9, %11 : vector<16x128xf32>
    %c0_9 = arith.constant 0 : index
    %c0_10 = arith.constant 0 : index
    %13 = vector.load %arg8[%c0_9, %c0_10] : memref<16x128xf32, #tpu.memory_space<vmem>>, vector<16x128xf32>
    tpu.vector_store %arg8[%c0_9, %c0_10], %12 {strides = array<i32>} : memref<16x128xf32, #tpu.memory_space<vmem>>, vector<16x128xf32>,
    %c0_i32_11 = arith.constant 0 : i32
    %14 = arith.cmpi eq, %arg1, %c0_i32_11 : i32
    %15 = arith.extui %14 : i1 to i32
    %c0_i32_12 = arith.constant 0 : i32
    %16 = arith.cmpi ne, %15, %c0_i32_12 : i32
    scf.if %16 {
      %c0_15 = arith.constant 0 : index
      %c0_16 = arith.constant 0 : index
      %20 = vector.load %arg9[%c0_15, %c0_16] : memref<16x4xf32, #tpu.memory_space<vmem>>, vector<16x4xf32>
      %c0_17 = arith.constant 0 : index
      %c0_18 = arith.constant 0 : index
      %21 = vector.load %arg5[%c0_17, %c0_18] : memref<128x4xf32, #tpu.memory_space<vmem>>, vector<128x4xf32>
      %cst_19 = arith.constant dense<0.000000e+00> : vector<16x4xf32>
      %22 = tpu.matmul %8, %21, %cst_19 {dimension_numbers = #tpu.dot_dimension_numbers<[1], [0], [0], [1], [0, 0, 1, 1], [], []>} : vector<16x128xf32>, vector<128x4xf32>, vector<16x4xf32> -> vector<16x4xf32>
      %23 = arith.addf %20, %22 : vector<16x4xf32>
      %c0_20 = arith.constant 0 : index
      %c0_21 = arith.constant 0 : index
      %24 = vector.load %arg9[%c0_20, %c0_21] : memref<16x4xf32, #tpu.memory_space<vmem>>, vector<16x4xf32>
      tpu.vector_store %arg9[%c0_20, %c0_21], %23 {strides = array<i32>} : memref<16x4xf32, #tpu.memory_space<vmem>>, vector<16x4xf32>,
    } else {
    }
    %c0_i32_13 = arith.constant 0 : i32
    %17 = arith.cmpi eq, %arg2, %c0_i32_13 : i32
    %18 = arith.extui %17 : i1 to i32
    %c0_i32_14 = arith.constant 0 : i32
    %19 = arith.cmpi ne, %18, %c0_i32_14 : i32
    scf.if %19 {
      %c0_15 = arith.constant 0 : index
      %c0_16 = arith.constant 0 : index
      %20 = vector.load %arg9[%c0_15, %c0_16] : memref<16x4xf32, #tpu.memory_space<vmem>>, vector<16x4xf32>
      %c0_17 = arith.constant 0 : index
      %c0_18 = arith.constant 0 : index
      %21 = vector.load %arg6[%c0_17, %c0_18] : memref<4x128xf32, #tpu.memory_space<vmem>>, vector<4x128xf32>
      %cst_19 = arith.constant dense<0.000000e+00> : vector<16x128xf32>
      %22 = tpu.matmul %20, %21, %cst_19 {dimension_numbers = #tpu.dot_dimension_numbers<[1], [0], [0], [1], [0, 0, 1, 1], [], []>} : vector<16x4xf32>, vector<4x128xf32>, vector<16x128xf32> -> vector<16x128xf32>
      %c0_20 = arith.constant 0 : index
      %c0_21 = arith.constant 0 : index
      %23 = vector.load %arg8[%c0_20, %c0_21] : memref<16x128xf32, #tpu.memory_space<vmem>>, vector<16x128xf32>
      %24 = arith.addf %23, %22 : vector<16x128xf32>
      %c0_22 = arith.constant 0 : index
      %c0_23 = arith.constant 0 : index
      %25 = vector.load %arg7[%c0_22, %c0_23] : memref<16x128xf32, #tpu.memory_space<vmem>>, vector<16x128xf32>
      tpu.vector_store %arg7[%c0_22, %c0_23], %24 {strides = array<i32>} : memref<16x128xf32, #tpu.memory_space<vmem>>, vector<16x128xf32>,
    } else {
    }
    return
  }
  func.func @transform_0(%arg0: i32, %arg1: i32, %arg2: i32) -> (i32, i32) {
    %c0_i32 = arith.constant 0 : i32
    return %arg0, %arg2 : i32, i32
  }
  func.func @transform_1(%arg0: i32, %arg1: i32, %arg2: i32) -> (i32, i32) {
    %c0_i32 = arith.constant 0 : i32
    return %arg2, %arg1 : i32, i32
  }
  func.func @transform_2(%arg0: i32, %arg1: i32, %arg2: i32) -> (i32, i32) {
    %c0_i32 = arith.constant 0 : i32
    %c0_i32_0 = arith.constant 0 : i32
    return %arg2, %c0_i32 : i32, i32
  }
  func.func @transform_3(%arg0: i32, %arg1: i32, %arg2: i32) -> (i32, i32) {
    %c0_i32 = arith.constant 0 : i32
    %c0_i32_0 = arith.constant 0 : i32
    return %c0_i32, %arg1 : i32, i32
  }
  func.func @transform_4(%arg0: i32, %arg1: i32, %arg2: i32) -> (i32, i32) {
    %c0_i32 = arith.constant 0 : i32
    return %arg0, %arg1 : i32, i32
  }
}

</mosaic_0001>

<bundles_post_ra>
// kernel: tpu_custom_call.1
= control target key start
LH: loop header
LB: loop body
LE: loop exit
PB: predicated region body
PF: predicated region fallthrough
CT: control target
= control target key end

     0   :  { %9 = vsyncpa [#allocation5], 0  ;;  %s762_s0 = inlined_call_operand.hbm [shape: f32[16,128], index: 0, kind: input, shape index: {}]   ;;  %s763_s1 = inlined_call_operand.vmem [shape: f32[128,128], index: 1, kind: input, shape index: {}]   ;;  %s764_s2 = inlined_call_operand.vmem [shape: f32[128,4], index: 2, kind: input, shape index: {}]   ;;  %s765_s3 = inlined_call_operand.vmem [shape: f32[4,128], index: 3, kind: input, shape index: {}]   ;;  %s766_s4 = inlined_call_operand.hbm [shape: f32[16,128], index: 4, kind: output, shape index: {}]  }
   0x1   :  { %10 = vsyncpa [#allocation6], 0  ;;  %s597_s15 = smov [#allocation4]   ;;  %s549_s19 = scalar_lea.hbm %s762_s0, 256 }
   0x2   :  { %s16_s16 = sshll.u32 %s597_s15, 4  ;;  %p550_p0 = scmp.ne.s32.totalorder %s762_s0, %s549_s19  ;;  %s17_s16 = int_to_ptr.vmem [resolvable:$true] %s16_s16 }
   0x3   :  { %p553_p1 = scmp.lt.u32.totalorder %s549_s19, %s762_s0 }
   0x5   :  { %p555_p2 = pnand %p553_p1, %p550_p0 }
   0x7   :  { %558 = shalt.err (!%p555_p2)
}
   0x8   :  { %s559_s24 = scalar_lea.vmem %s17_s16, 256  ;;  %p564_p4 = scmp.lt.s32.totalorder %s17_s16, %s17_s16 }
   0x9   :  { %p560_p3 = scmp.ne.s32.totalorder %s17_s16, %s559_s24  ;;  %p565_p5 = scmp.lt.s32.totalorder %s559_s24, %s559_s24 }
   0xb   :  { %p566_p6 = por %p565_p5, %p564_p4 }
   0xd   :  { %p567_p7 = pnand %p566_p6, %p560_p3 }
   0xf   :  { %570 = shalt.err (!%p567_p7)
}
  0x10   :  { %s598_s25 = smov 128   ;;  %s599_s26 = smov 8  }
  0x11   :  { %22 = dma.hbm_to_vmem [thread:$0]  %s762_s0, 256, %s17_s16, [#allocation5], %s598_s25, %s598_s25, %s599_s26  }
  0x12   :  { %593 = dma.done.wait [#allocation5], 256  }
  0x13   :  { %594 = vsyncadd [#allocation5], 4294967040  ;;  %vm43_vm0 = vcmask 31744   ;;  %v600_v0 = vmov 0.0   ;;  %v150_v1 = vld [vmem:[%s764_s2] sm:$0xff]  ;;  %v151_v2 = vld [vmem:[%s764_s2 + $0x8] sm:$0xff] }
  0x14   :  { %45 = vst.msk [vmem:[#allocation3 + $0x8] sm:$0xff] %vm43_vm0, %v600_v0  ;;  %44 = vst.msk [vmem:[#allocation3] sm:$0xff] %vm43_vm0, %v600_v0  ;;  %v152_v3 = vld [vmem:[%s764_s2 + $0x10] sm:$0xff]  ;;  %v510_v4 = vpack.c.bf16 %v151_v2, %v150_v1  ;;  %v153_v5 = vld [vmem:[%s764_s2 + $0x18] sm:$0xff]  ;;  %vm259_vm1 = vcmask 1043456  }
  0x15   :  { %v514_v6 = vpack.c.bf16 %v153_v5, %v152_v3  ;;  %v154_v7 = vld [vmem:[%s764_s2 + $0x20] sm:$0xff]  ;;  %v155_v8 = vld [vmem:[%s764_s2 + $0x28] sm:$0xff]  ;;  %v156_v10 = vld [vmem:[%s764_s2 + $0x30] sm:$0xff] }
  0x16   :  { %511 = vmatprep.subr.bf16.mxu1 %v510_v4  ;;  %v518_v9 = vpack.c.bf16 %v155_v8, %v154_v7  ;;  %v157_v11 = vld [vmem:[%s764_s2 + $0x38] sm:$0xff]  ;;  %v46_v12 = vld [vmem:[#allocation4] sm:$0xff]  ;;  %v50_v13 = vld [vmem:[%s763_s1] sm:$0xff] }
  0x17   :  { %513 = vmatpush3.bf16.msra.mxu1 %v510_v4  ;;  %470 = vmatprep.mubr.f32.mxu1 %v46_v12  ;;  %v51_v14 = vld [vmem:[%s763_s1 + $0x8] sm:$0xff]  ;;  %v52_v15 = vld [vmem:[%s763_s1 + $0x10] sm:$0xff]  ;;  %v53_v17 = vld [vmem:[%s763_s1 + $0x18] sm:$0xff]  ;;  %v522_v21 = vpack.c.bf16 %v157_v11, %v156_v10 }
  0x18   :  { %515 = vmatprep.subr.bf16.mxu1 %v514_v6  ;;  %435 = vmatprep.mubr.f32.mxu0 %v46_v12  ;;  %v478_v16 = vpack.c.bf16 %v51_v14, %v50_v13  ;;  %v482_v18 = vpack.c.bf16 %v53_v17, %v52_v15  ;;  %v54_v19 = vld [vmem:[%s763_s1 + $0x20] sm:$0xff]  ;;  %v55_v20 = vld [vmem:[%s763_s1 + $0x28] sm:$0xff]  ;;  %v56_v25 = vld [vmem:[%s763_s1 + $0x30] sm:$0xff] }
  0x19   :  { %v158_v22 = vld [vmem:[%s764_s2 + $0x40] sm:$0xff]  ;;  %v159_v23 = vld [vmem:[%s764_s2 + $0x48] sm:$0xff]  ;;  %v486_v24 = vpack.c.bf16 %v55_v20, %v54_v19  ;;  %v57_v26 = vld [vmem:[%s763_s1 + $0x38] sm:$0xff] }
  0x1a   :  { %479 = vmatprep.subr.bf16.mxu0 %v478_v16  ;;  %v526_v27 = vpack.c.bf16 %v159_v23, %v158_v22  ;;  %v160_v28 = vld [vmem:[%s764_s2 + $0x50] sm:$0xff]  ;;  %v161_v29 = vld [vmem:[%s764_s2 + $0x58] sm:$0xff]  ;;  %v490_v30 = vpack.c.bf16 %v57_v26, %v56_v25  ;;  %v58_v31 = vld [vmem:[%s763_s1 + $0x40] sm:$0xff] }
  0x1b   :  { %517 = vmatpush3.bf16.msra.mxu1 %v514_v6  ;;  %481 = vmatpush3.bf16.msra.mxu0 %v478_v16  ;;  %v59_v32 = vld [vmem:[%s763_s1 + $0x48] sm:$0xff]  ;;  %v530_v33 = vpack.c.bf16 %v161_v29, %v160_v28  ;;  %v162_v34 = vld [vmem:[%s764_s2 + $0x60] sm:$0xff]  ;;  %v60_v37 = vld [vmem:[%s763_s1 + $0x50] sm:$0xff] }
  0x1c   :  { %519 = vmatprep.subr.bf16.mxu1 %v518_v9  ;;  %483 = vmatprep.subr.bf16.mxu0 %v482_v18  ;;  %v163_v35 = vld [vmem:[%s764_s2 + $0x68] sm:$0xff]  ;;  %v494_v36 = vpack.c.bf16 %v59_v32, %v58_v31  ;;  %v61_v38 = vld [vmem:[%s763_s1 + $0x58] sm:$0xff]  ;;  %v164_v40 = vld [vmem:[%s764_s2 + $0x70] sm:$0xff] }
  0x1d   :  { %v534_v39 = vpack.c.bf16 %v163_v35, %v162_v34  ;;  %v165_v41 = vld [vmem:[%s764_s2 + $0x78] sm:$0xff]  ;;  %v498_v42 = vpack.c.bf16 %v61_v38, %v60_v37  ;;  %v62_v43 = vld [vmem:[%s763_s1 + $0x60] sm:$0xff]  ;;  %v63_v44 = vld [vmem:[%s763_s1 + $0x68] sm:$0xff] }
  0x1e   :  { %v538_v45 = vpack.c.bf16 %v165_v41, %v164_v40  ;;  %v502_v46 = vpack.c.bf16 %v63_v44, %v62_v43  ;;  %v64_v47 = vld [vmem:[%s763_s1 + $0x70] sm:$0xff]  ;;  %v65_v48 = vld [vmem:[%s763_s1 + $0x78] sm:$0xff]  ;;  %v251_v51 = vld [vmem:[%s765_s3] sm:$0xf]  ;;  %s601_s1 = smov [#allocation7]  }
  0x1f   :  { %521 = vmatpush3.bf16.msra.mxu1 %v518_v9  ;;  %485 = vmatpush3.bf16.msra.mxu0 %v482_v18  ;;  %v506_v49 = vpack.c.bf16 %v65_v48, %v64_v47  ;;  %v47_v50 = vld [vmem:[#allocation4 + $0x8] sm:$0xff]  ;;  %v149_v52 = vld [vmem:[#allocation3 + $0x8] sm:$0xff]  ;;  %v148_v53 = vld [vmem:[#allocation3] sm:$0xff]  ;;  %s349_s3 = sshll.u32 %s601_s1, 4  ;;  %s350_s3 = int_to_ptr.vmem [resolvable:$true] %s349_s3 }
  0x20   :  { %523 = vmatprep.subr.bf16.mxu1 %v522_v21  ;;  %487 = vmatprep.subr.bf16.mxu0 %v486_v24  ;;  %s571_s17 = scalar_lea.vmem %s350_s3, 256  ;;  %p576_p9 = scmp.lt.s32.totalorder %s350_s3, %s350_s3 }
  0x21   :  { %p572_p8 = scmp.ne.s32.totalorder %s350_s3, %s571_s17  ;;  %p577_p10 = scmp.lt.s32.totalorder %s571_s17, %s571_s17 }
  0x23   :  { %525 = vmatpush3.bf16.msra.mxu1 %v522_v21  ;;  %489 = vmatpush3.bf16.msra.mxu0 %v486_v24  ;;  %p578_p11 = por %p577_p10, %p576_p9 }
  0x24   :  { %527 = vmatprep.subr.bf16.mxu1 %v526_v27  ;;  %491 = vmatprep.subr.bf16.mxu0 %v490_v30 }
  0x25   :  { %p579_p12 = pnand %p578_p11, %p572_p8 }
  0x27   :  { %529 = vmatpush3.bf16.msra.mxu1 %v526_v27  ;;  %493 = vmatpush3.bf16.msra.mxu0 %v490_v30 }
  0x28   :  { %531 = vmatprep.subr.bf16.mxu1 %v530_v33  ;;  %495 = vmatprep.subr.bf16.mxu0 %v494_v36 }
  0x2b   :  { %533 = vmatpush3.bf16.msra.mxu1 %v530_v33  ;;  %497 = vmatpush3.bf16.msra.mxu0 %v494_v36 }
  0x2c   :  { %535 = vmatprep.subr.bf16.mxu1 %v534_v39  ;;  %499 = vmatprep.subr.bf16.mxu0 %v498_v42 }
  0x2f   :  { %537 = vmatpush3.bf16.msra.mxu1 %v534_v39  ;;  %501 = vmatpush3.bf16.msra.mxu0 %v498_v42 }
  0x30   :  { %539 = vmatprep.subr.bf16.mxu1 %v538_v45  ;;  %503 = vmatprep.subr.bf16.mxu0 %v502_v46 }
  0x33   :  { %541 = vmatpush3.bf16.msra.mxu1 %v538_v45  ;;  %505 = vmatpush3.bf16.msra.mxu0 %v502_v46 }
  0x34   :  { %507 = vmatprep.subr.bf16.mxu0 %v506_v49 }
  0x36   :  { %471 = vmatmul.mubr.f32.vlgmr.msra.gmra.mrb[0].mxu1 %v47_v50 }
  0x37   :  { %509 = vmatpush3.bf16.msra.mxu0 %v506_v49 }
  0x38   :  { %473 = vmatprep.subr.msk.mxu0 %vm259_vm1, %v251_v51 }
  0x3a   :  { %436 = vmatmul.mubr.f32.vlgmr.msra.gmra.mrb[0].mxu0 %v47_v50 }
  0x3b   :  { %474 = vmatpush3.msk.msra.mxu0 %vm259_vm1, %v251_v51 }
 0x109   :  { %v472_v54 = vpop.f32.mrb[0].mxu1 }
 0x10a   :  { %v242_v55 = vadd.f32 %v472_v54, %v149_v52  ;;  %v232_v56 = vpop.f32.mrb[1].mxu1 }
 0x10b   :  { %v241_v57 = vadd.f32 %v232_v56, %v148_v53 }
 0x10c   :  { %245 = vst.msk [vmem:[#allocation3 + $0x8] sm:$0xff] %vm43_vm0, %v242_v55 }
 0x10d   :  { %244 = vst.msk [vmem:[#allocation3] sm:$0xff] %vm43_vm0, %v241_v57 }
 0x113   :  { %v250_v59 = vld [vmem:[#allocation3 + $0x8] sm:$0xff] }
 0x114   :  { %v249_v58 = vld [vmem:[#allocation3] sm:$0xff] }
 0x115   :  { %475 = vmatprep.mubr.msk.f32.mxu0 %vm43_vm0, %v249_v58 }
 0x116   :  { %476 = vmatmul.mubr.msk.f32.vlgmr.msra.gmra.mrb[0].mxu0 %vm43_vm0, %v250_v59 }
 0x1e9   :  { %v477_v60 = vpop.f32.mrb[0].mxu0 }
 0x1ea   :  { %343 = vst [vmem:[#allocation7 + $0x8] sm:$0xff] %v477_v60  ;;  %v329_v61 = vpop.f32.mrb[1].mxu0 }
 0x1eb   :  { %342 = vst [vmem:[#allocation7] sm:$0xff] %v329_v61 }
 0x1ec   :  { %582 = shalt.err (!%p579_p12)
}
 0x1ed   :  { %s583_s20 = scalar_lea.hbm %s766_s4, 256 }
 0x1ee   :  { %p584_p13 = scmp.ne.s32.totalorder %s766_s4, %s583_s20  ;;  %p587_p0 = scmp.lt.u32.totalorder %s583_s20, %s766_s4 }
 0x1f0   :  { %p589_p1 = pnand %p587_p0, %p584_p13 }
 0x1f2   :  { %592 = shalt.err (!%p589_p1)
}
 0x1f3   :  { %355 = dma.vmem_to_hbm [thread:$0]  %s350_s3, 256, %s766_s4, [#allocation6], %s598_s25, %s598_s25, %s599_s26  }
 0x1f4   :  { %595 = dma.done.wait [#allocation6], 256  }
 0x1f5   :  { %596 = vsyncadd [#allocation6], 4294967040 }
 0x1f6   :  { %359 = vsyncpa [#allocation5], 1 }
 0x1f7   :  { %360 = vsyncpa [#allocation6], 1 }

</bundles_post_ra>
